<compile_context>
chip_gen: v6e
topology: v6e:2x2x1
jax: 0.10.0
libtpu: 0.0.40
codegen_flags: <defaults>
</compile_context>

<pallas_src>
import functools

import jax
import jax.numpy as jnp
from jax.experimental import pallas as pl
from jax.experimental.pallas import tpu as pltpu


_VMEM_LIMIT_BYTES = 48 * 1024 * 1024      # scoped-VMEM request: fits v7x (64 MiB phys), lifts v5e/v6e defaults
_X_TILE_BUDGET_BYTES = 32 * 1024 * 1024   # budget for the double-buffered (tb, D) activation tiles


def _round_up(n: int, m: int) -> int:
    return ((n + m - 1) // m) * m


def _choose_tb(B: int, D: int, itemsize: int) -> int:
    """Batch-tile size: sublane-aligned, sized so 2 * tb * round_up(D,128) * itemsize fits budget."""
    d_pad = _round_up(D, 128)                              # lane-padded row footprint in VMEM
    tb = _X_TILE_BUDGET_BYTES // (2 * d_pad * itemsize)    # 2x = double buffering
    tb = max(8, (tb // 8) * 8)                             # multiple of 8 (sublane)
    tb = min(tb, 1024)                                     # >=512 already sits at ~85% of HBM roofline
    tb = min(tb, _round_up(B, 8))                          # never bigger than the (padded) batch
    # v7x megacore: keep >= 2 grid steps when the batch allows, so both TCs stream HBM.
    if B >= 16 and pl.cdiv(B, tb) < 2:
        tb = max(8, _round_up(pl.cdiv(B, 2), 8))
    return int(tb)


def _head_kernel(x_ref, w_ref, o_ref):
    # x_ref: (tb, D) last-token activations; w_ref: (1, D); o_ref: (tb, 1).
    # VPU multiply + XLU lane reduce (no N=1 MXU matmul), f32 accumulation.
    prod = x_ref[...].astype(jnp.float32) * w_ref[...].astype(jnp.float32)   # (tb, D)
    o_ref[...] = jnp.sum(prod, axis=-1, keepdims=True).astype(o_ref.dtype)


@functools.partial(jax.jit, static_argnames=("tb", "select_in_kernel"))
def _forward(x, weight, bias, *, tb, select_in_kernel):
    B, T, D = x.shape
    w_row = weight.reshape(1, D)   # nn.Linear weight (1, D) (or its (D, 1) transpose) -> lane-aligned row

    if select_in_kernel:
        # In-kernel T-select: squeezed size-1 block on the T axis pinned to the last token.
        x_in = x
        x_spec = pl.BlockSpec((tb, None, D), lambda i: (i, T - 1, 0))
    else:
        # Fallback path (only if Mosaic rejects the size-1 block above): wrapper-side slice.
        x_in = x[:, -1, :]
        x_spec = pl.BlockSpec((tb, D), lambda i: (i, 0))

    itemsize_x = jnp.dtype(x.dtype).itemsize
    cost = pl.CostEstimate(
        flops=2 * B * D,
        transcendentals=0,
        bytes_accessed=B * D * itemsize_x + D * jnp.dtype(weight.dtype).itemsize + B * 4,
    )

    out = pl.pallas_call(
        _head_kernel,
        out_shape=jax.ShapeDtypeStruct((B, 1), jnp.float32),
        grid=(pl.cdiv(B, tb),),                 # no padding: Pallas clips the partial last block
        in_specs=[
            x_spec,                             # batch-tiled last-token activations
            pl.BlockSpec((1, D), lambda i: (0, 0)),   # weight row, resident across the grid
        ],
        out_specs=pl.BlockSpec((tb, 1), lambda i: (i, 0)),
        compiler_params=pltpu.CompilerParams(
            dimension_semantics=("parallel",),          # megacore sharding on v7x; no-op on v5e/v6e
            vmem_limit_bytes=_VMEM_LIMIT_BYTES,
        ),
        cost_estimate=cost,
    )(x_in, w_row)

    # Bias add + squeeze(-1) in the wrapper; garbage tail rows (if any) were never written back.
    return out[:, 0] + bias.reshape(()).astype(jnp.float32)


# Lazily probed: does this Mosaic build accept the squeezed size-1 block along T?
_T_SELECT_SUPPORTED = None


def classification_head(x, weight, bias, *, tb=None):
    """x: (B, T, D); weight: (1, D) (nn.Linear layout) or (D, 1); bias: (1,). Returns (B,) f32.

    Matches PyTorch: x[:, -1, :] @ W^T + b, then squeeze(-1).
    """
    global _T_SELECT_SUPPORTED
    B, T, D = x.shape
    if tb is None:
        tb = _choose_tb(B, D, jnp.dtype(x.dtype).itemsize)
    else:
        tb = max(8, _round_up(int(tb), 8))

    if _T_SELECT_SUPPORTED is None:
        try:
            out = jax.block_until_ready(
                _forward(x, weight, bias, tb=tb, select_in_kernel=True))
            _T_SELECT_SUPPORTED = True
            return out
        except Exception:
            # TODO(synk): if this path is ever taken, replace the wrapper slice with a manual
            # strided pltpu.make_async_copy from an ANY-space x to keep HBM traffic at 1x.
            _T_SELECT_SUPPORTED = False

    return _forward(x, weight, bias, tb=tb, select_in_kernel=_T_SELECT_SUPPORTED)


if __name__ == "__main__":
    key = jax.random.PRNGKey(0)
    kx, kw, kb, kx2, kw2 = jax.random.split(key, 5)

    # Small shapes consistent with the module: batch=2, seq=8, n_embd=32.
    B, T, D = 2, 8, 32
    x = jax.random.normal(kx, (B, T, D), dtype=jnp.float32)
    bound = 1.0 / (D ** 0.5)
    weight = jax.random.uniform(kw, (1, D), minval=-bound, maxval=bound, dtype=jnp.float32)
    bias = jax.random.uniform(kb, (1,), minval=-bound, maxval=bound, dtype=jnp.float32)

    out = classification_head(x, weight, bias)
    out = jax.block_until_ready(out)
    ref = (x[:, -1, :] @ weight.reshape(D, 1) + bias).squeeze(-1)
    assert out.shape == (B,)
    assert jnp.allclose(out, ref, atol=1e-5, rtol=1e-5)

    # Multi-step grid with a partial last block (B not a multiple of tb, no padding anywhere).
    B2, T2, D2 = 20, 8, 128
    x2 = jax.random.normal(kx2, (B2, T2, D2), dtype=jnp.float32)
    bound2 = 1.0 / (D2 ** 0.5)
    w2 = jax.random.uniform(kw2, (1, D2), minval=-bound2, maxval=bound2, dtype=jnp.float32)
    out2 = jax.block_until_ready(classification_head(x2, w2, bias, tb=8))
    ref2 = (x2[:, -1, :] @ w2.reshape(D2, 1) + bias).squeeze(-1)
    assert out2.shape == (B2,)
    assert jnp.allclose(out2, ref2, atol=1e-4, rtol=1e-4)

    print("KERNEL_OK")
</pallas_src>

<mosaic_0001>
module attributes {stable_mosaic.version = 11 : i64} {
  func.func @_head_kernel(%arg0: i32, %arg1: memref<8x32xf32, #tpu.memory_space<vmem>>, %arg2: memref<1x32xf32, #tpu.memory_space<vmem>>, %arg3: memref<8x1xf32, #tpu.memory_space<vmem>>) attributes {dimension_semantics = [#tpu.dimension_semantics<parallel>], iteration_bounds = array<i64: 1>, scalar_prefetch = 0 : i64, scratch_operands = 0 : i64, tpu.core_type = #tpu.core_type<tc>, window_params = [{transform_indices = @transform_0, window_bounds = array<i64: 8, 32>}, {pipeline_mode = #tpu.pipeline_mode<synchronous>, transform_indices = @transform_1, window_bounds = array<i64: 1, 32>}, {transform_indices = @transform_2, window_bounds = array<i64: 8, 1>}]} {
    %c0 = arith.constant 0 : index
    %c0_0 = arith.constant 0 : index
    %0 = vector.load %arg1[%c0, %c0_0] : memref<8x32xf32, #tpu.memory_space<vmem>>, vector<8x32xf32>
    %c0_1 = arith.constant 0 : index
    %c0_2 = arith.constant 0 : index
    %1 = vector.load %arg2[%c0_1, %c0_2] : memref<1x32xf32, #tpu.memory_space<vmem>>, vector<1x32xf32>
    %2 = vector.broadcast %1 : vector<1x32xf32> to vector<8x32xf32>
    %3 = arith.mulf %0, %2 : vector<8x32xf32>
    %cst = arith.constant dense<0.000000e+00> : vector<8xf32>
    %4 = vector.multi_reduction <add>, %3, %cst [1] : vector<8x32xf32> to vector<8xf32>
    %5 = vector.shape_cast %4 : vector<8xf32> to vector<8x1xf32>
    %c0_3 = arith.constant 0 : index
    %c0_4 = arith.constant 0 : index
    %6 = vector.load %arg3[%c0_3, %c0_4] : memref<8x1xf32, #tpu.memory_space<vmem>>, vector<8x1xf32>
    tpu.vector_store %arg3[%c0_3, %c0_4], %5 {strides = array<i32>} : memref<8x1xf32, #tpu.memory_space<vmem>>, vector<8x1xf32>,
    return
  }
  func.func @transform_0(%arg0: i32) -> (i32, i32) {
    %c0_i32 = arith.constant 0 : i32
    %c0_i32_0 = arith.constant 0 : i32
    return %arg0, %c0_i32 : i32, i32
  }
  func.func @transform_1(%arg0: i32) -> (i32, i32) {
    %c0_i32 = arith.constant 0 : i32
    %c0_i32_0 = arith.constant 0 : i32
    %c0_i32_1 = arith.constant 0 : i32
    return %c0_i32, %c0_i32_0 : i32, i32
  }
  func.func @transform_2(%arg0: i32) -> (i32, i32) {
    %c0_i32 = arith.constant 0 : i32
    %c0_i32_0 = arith.constant 0 : i32
    return %arg0, %c0_i32 : i32, i32
  }
}

</mosaic_0001>

<bundles_post_ra>
// kernel: _forward.1
= control target key start
LH: loop header
LB: loop body
LE: loop exit
PB: predicated region body
PF: predicated region fallthrough
CT: control target
= control target key end

     0   :  { %vm20_vm0 = vcmask 261120   ;;  %vm24_vm1 = vcmask 7168   ;;  %s92_s0 = inlined_call_operand.vmem [shape: f32[2,32], index: 0, kind: input, shape index: {}]   ;;  %s93_s1 = inlined_call_operand.vmem [shape: f32[1,32], index: 1, kind: input, shape index: {}]   ;;  %s94_s2 = inlined_call_operand.vmem [shape: f32[2,1], index: 2, kind: output, shape index: {}]  }
   0x1   :  { %v11_v0 = vld [vmem:[%s92_s0] sm:$0xff] }
   0x2   :  { %v67_v1 = vld [vmem:[%s93_s1] ss:$0 sm:$0xff] }
   0x3   :  { %v19_v2 = vmul.f32 %v67_v1, %v11_v0 }
   0x5   :  { %v21_v3 = vsel %vm20_vm0, %v19_v2, 0.0 }
   0x6   :  { %22 = vadd.xlane.f32.xlu0 %v21_v3 }
  0x8f   :  { %v23_v4 = vpop.xlane.xlu0 %22 }
  0x90   :  { %25 = vst.msk [vmem:[#allocation2] sm:$0xff] %vm24_vm1, %v23_v4 }
  0x97   :  { %v44_v5 = vld [vmem:[#allocation2] sm:$0x3] }
  0x98   :  { %45 = vst [vmem:[%s94_s2] sm:$0x3] %v44_v5 }

</bundles_post_ra>
